<compile_context>
chip_gen: v7x
topology: tpu7x:2x2x1
jax: 0.10.0
libtpu: 0.0.40
codegen_flags: <defaults>
</compile_context>

<pallas_src>
import math

import numpy as np

import jax
import jax.numpy as jnp
from jax.experimental import pallas as pl
from jax.experimental.pallas import tpu as pltpu


def _norm_sigma(sigma):
    if isinstance(sigma, (int, float)):
        return float(sigma), float(sigma)
    return float(sigma[0]), float(sigma[1])


def _gauss_taps(ksize: int, sigma: float) -> np.ndarray:
    # matches torch: exp(-(x - ksize//2)**2 / (2*sigma**2)), normalized to sum 1
    xs = np.arange(ksize, dtype=np.float64)
    g = np.exp(-((xs - ksize // 2) ** 2) / (2.0 * sigma ** 2))
    return g / g.sum()


def _interior_band(n: int, taps: np.ndarray, pad: int) -> np.ndarray:
    # M[i, i + d] = taps[d + pad] for |d| <= pad, clipped to [0, n)
    m = np.zeros((n, n), dtype=np.float64)
    for i in range(n):
        lo = max(0, i - pad)
        hi = min(n, i + pad + 1)
        for r in range(lo, hi):
            m[i, r] = taps[r - i + pad]
    return m


def _choose_block_images(n: int, h: int, w: int, itemsize: int) -> int:
    """Images per grid step: large enough to amortize per-step overhead, small
    enough for VMEM (double-buffered in/out in native dtype + f32 temps)."""
    per_img = h * w * (4 * itemsize + 3 * 4)
    cap = max(1, min(32, (8 * 1024 * 1024) // max(per_img, 1)))
    t = 1
    for d in range(1, n + 1):
        if n % d == 0 and d <= cap:
            t = d
    # keep >= 2 grid steps so the "parallel" axis can split across v7x's 2 TCs
    if t == n and n >= 2:
        for d in range(n - 1, 0, -1):
            if n % d == 0:
                t = d
                break
    return t


def _make_kernel(t_imgs: int, h: int, w: int):
    # (T,H,W) -> (T*H,W) is a layout-preserving (no-op) reshape iff H % 8 == 0.
    fold = (h % 8 == 0)

    def kernel(ai_ref, bi_ref, cmm_ref, x_ref, o_ref):
        ai = ai_ref[...]        # (H, H) banded, resident across grid steps
        bi = bi_ref[...]        # (W, W) banded, resident across grid steps
        corr = cmm_ref[...]     # (H, W) = mean * (1 - rowsum(Ai) (x) colsum(Bi))
        xb = x_ref[...].astype(jnp.float32)   # (T, H, W) block

        if fold:
            # W-axis pass: one big (T*H, W) @ (W, W) MXU matmul (no lane slicing)
            v = jnp.dot(xb.reshape(t_imgs * h, w), bi,
                        preferred_element_type=jnp.float32)
            for t in range(t_imgs):                     # static unroll, T small
                y = jnp.dot(ai, v[t * h:(t + 1) * h, :],
                            preferred_element_type=jnp.float32)   # H-axis pass
                o_ref[t] = (y + corr).astype(o_ref.dtype)
        else:
            for t in range(t_imgs):
                v_t = jnp.dot(xb[t], bi, preferred_element_type=jnp.float32)
                y = jnp.dot(ai, v_t, preferred_element_type=jnp.float32)
                o_ref[t] = (y + corr).astype(o_ref.dtype)

    return kernel


def make_gaussian_filter(sigma):
    """Returns forward(x) equivalent to GaussianFilter(sigma).forward(x)."""
    sigma_x, sigma_y = _norm_sigma(sigma)
    ksize_x = int(2 * math.ceil(sigma_x * 2.0) + 1)   # taps along H
    ksize_y = int(2 * math.ceil(sigma_y * 2.0) + 1)   # taps along W
    pad_x = (ksize_x - 1) // 2
    pad_y = (ksize_y - 1) // 2
    kx = _gauss_taps(ksize_x, sigma_x)
    ky = _gauss_taps(ksize_y, sigma_y)

    def forward(x):
        if x.ndim != 4:
            raise ValueError(f"Invalid input shape, expect BxCxHxW. Got: {x.shape}")
        b, c, h, w = x.shape
        n = b * c

        # Trace-time constant banded matrices (exactly reproduce the padded conv).
        ai_np = _interior_band(h, kx, pad_x)              # (H, H): Ai[h,r]=kx[r-h+pad_x]
        bi_np = _interior_band(w, ky, pad_y).T            # (W, W): Bi[r,w]=ky[r-w+pad_y]
        cm_np = 1.0 - np.outer(ai_np.sum(axis=1), bi_np.sum(axis=0))   # (H, W)

        ai = jnp.asarray(ai_np, dtype=jnp.float32)
        bi = jnp.asarray(bi_np, dtype=jnp.float32)
        # Fold the global-mean pad value into the tiny boundary-correction map.
        mean_val = jnp.mean(x, dtype=jnp.float32)
        cmm = mean_val * jnp.asarray(cm_np, dtype=jnp.float32)

        t_imgs = _choose_block_images(n, h, w, int(np.dtype(x.dtype).itemsize))
        xr = x.reshape(n, h, w)

        out = pl.pallas_call(
            _make_kernel(t_imgs, h, w),
            out_shape=jax.ShapeDtypeStruct((n, h, w), x.dtype),
            grid=(n // t_imgs,),
            in_specs=[
                pl.BlockSpec((h, h), lambda g: (0, 0)),            # Ai (resident)
                pl.BlockSpec((w, w), lambda g: (0, 0)),            # Bi (resident)
                pl.BlockSpec((h, w), lambda g: (0, 0)),            # mean*Cm (resident)
                pl.BlockSpec((t_imgs, h, w), lambda g: (g, 0, 0)),  # T-image block
            ],
            out_specs=pl.BlockSpec((t_imgs, h, w), lambda g: (g, 0, 0)),
            compiler_params=pltpu.CompilerParams(
                dimension_semantics=("parallel",),
                vmem_limit_bytes=32 * 1024 * 1024,
            ),
        )(ai, bi, cmm, xr)
        return out.reshape(b, c, h, w)

    return forward


def _reference_forward(x, sigma):
    """Pure-JAX (non-Pallas) reference: mean-pad then separable cross-correlation."""
    sigma_x, sigma_y = _norm_sigma(sigma)
    ksize_x = int(2 * math.ceil(sigma_x * 2.0) + 1)
    ksize_y = int(2 * math.ceil(sigma_y * 2.0) + 1)
    pad_x = (ksize_x - 1) // 2
    pad_y = (ksize_y - 1) // 2
    kx = _gauss_taps(ksize_x, sigma_x)
    ky = _gauss_taps(ksize_y, sigma_y)
    b, c, h, w = x.shape
    mean_val = jnp.mean(x, dtype=jnp.float32)
    hp, wp = h + 2 * pad_x, w + 2 * pad_y
    xp = jnp.full((b, c, hp, wp), mean_val, dtype=jnp.float32)
    xp = xp.at[:, :, pad_x:pad_x + h, pad_y:pad_y + w].set(x.astype(jnp.float32))
    acc = sum(float(kx[i]) * xp[:, :, i:i + h, :] for i in range(ksize_x))
    out = sum(float(ky[j]) * acc[:, :, :, j:j + w] for j in range(ksize_y))
    return out.astype(x.dtype)


if __name__ == "__main__":
    key = jax.random.PRNGKey(0)

    # Test 1: isotropic sigma, the module's canonical small shape.
    x1 = jax.random.normal(key, (2, 4, 16, 16), dtype=jnp.float32)
    f1 = make_gaussian_filter(1.0)           # ksize=5, pad=2
    y1 = f1(x1)
    jax.block_until_ready(y1)
    assert y1.shape == x1.shape and y1.dtype == x1.dtype
    r1 = _reference_forward(x1, 1.0)
    jax.block_until_ready(r1)
    d1 = float(np.max(np.abs(np.asarray(y1) - np.asarray(r1))))
    assert np.allclose(np.asarray(y1), np.asarray(r1), rtol=5e-2, atol=5e-2), d1

    # Test 2: anisotropic sigma, rectangular image, H not a multiple of 8
    # (exercises the unfolded per-image matmul path and H/W sigma pairing).
    x2 = jax.random.normal(jax.random.PRNGKey(1), (1, 3, 12, 16), dtype=jnp.float32)
    f2 = make_gaussian_filter((1.0, 2.0))    # ksize_H=5, ksize_W=9
    y2 = f2(x2)
    jax.block_until_ready(y2)
    assert y2.shape == x2.shape and y2.dtype == x2.dtype
    r2 = _reference_forward(x2, (1.0, 2.0))
    jax.block_until_ready(r2)
    d2 = float(np.max(np.abs(np.asarray(y2) - np.asarray(r2))))
    assert np.allclose(np.asarray(y2), np.asarray(r2), rtol=5e-2, atol=5e-2), d2

    print("KERNEL_OK")
</pallas_src>

<mosaic_0001>
module attributes {stable_mosaic.version = 11 : i64} {
  func.func @kernel(%arg0: i32, %arg1: memref<16x16xf32, #tpu.memory_space<vmem>>, %arg2: memref<16x16xf32, #tpu.memory_space<vmem>>, %arg3: memref<16x16xf32, #tpu.memory_space<vmem>>, %arg4: memref<4x16x16xf32, #tpu.memory_space<vmem>>, %arg5: memref<4x16x16xf32, #tpu.memory_space<vmem>>) attributes {dimension_semantics = [#tpu.dimension_semantics<parallel>], iteration_bounds = array<i64: 2>, scalar_prefetch = 0 : i64, scratch_operands = 0 : i64, tpu.core_type = #tpu.core_type<tc>, window_params = [{pipeline_mode = #tpu.pipeline_mode<synchronous>, transform_indices = @transform_0, window_bounds = array<i64: 16, 16>}, {pipeline_mode = #tpu.pipeline_mode<synchronous>, transform_indices = @transform_1, window_bounds = array<i64: 16, 16>}, {pipeline_mode = #tpu.pipeline_mode<synchronous>, transform_indices = @transform_2, window_bounds = array<i64: 16, 16>}, {transform_indices = @transform_3, window_bounds = array<i64: 4, 16, 16>}, {transform_indices = @transform_4, window_bounds = array<i64: 4, 16, 16>}]} {
    %c0 = arith.constant 0 : index
    %c0_0 = arith.constant 0 : index
    %0 = vector.load %arg1[%c0, %c0_0] : memref<16x16xf32, #tpu.memory_space<vmem>>, vector<16x16xf32>
    %c0_1 = arith.constant 0 : index
    %c0_2 = arith.constant 0 : index
    %1 = vector.load %arg2[%c0_1, %c0_2] : memref<16x16xf32, #tpu.memory_space<vmem>>, vector<16x16xf32>
    %c0_3 = arith.constant 0 : index
    %c0_4 = arith.constant 0 : index
    %2 = vector.load %arg3[%c0_3, %c0_4] : memref<16x16xf32, #tpu.memory_space<vmem>>, vector<16x16xf32>
    %c0_5 = arith.constant 0 : index
    %c0_6 = arith.constant 0 : index
    %c0_7 = arith.constant 0 : index
    %3 = vector.load %arg4[%c0_5, %c0_6, %c0_7] : memref<4x16x16xf32, #tpu.memory_space<vmem>>, vector<4x16x16xf32>
    %4 = vector.shape_cast %3 : vector<4x16x16xf32> to vector<64x16xf32>
    %cst = arith.constant dense<0.000000e+00> : vector<64x16xf32>
    %5 = tpu.matmul %4, %1, %cst {dimension_numbers = #tpu.dot_dimension_numbers<[1], [0], [0], [1], [0, 0, 1, 1], [], []>} : vector<64x16xf32>, vector<16x16xf32>, vector<64x16xf32> -> vector<64x16xf32>
    %6 = vector.extract_strided_slice %5 {offsets = [0, 0], sizes = [16, 16], strides = [1, 1]} : vector<64x16xf32> to vector<16x16xf32>
    %cst_8 = arith.constant dense<0.000000e+00> : vector<16x16xf32>
    %7 = tpu.matmul %0, %6, %cst_8 {dimension_numbers = #tpu.dot_dimension_numbers<[1], [0], [0], [1], [0, 0, 1, 1], [], []>} : vector<16x16xf32>, vector<16x16xf32>, vector<16x16xf32> -> vector<16x16xf32>
    %8 = arith.addf %7, %2 : vector<16x16xf32>
    %c0_9 = arith.constant 0 : index
    %c0_10 = arith.constant 0 : index
    %c0_11 = arith.constant 0 : index
    %9 = vector.load %arg5[%c0_9, %c0_10, %c0_11] : memref<4x16x16xf32, #tpu.memory_space<vmem>>, vector<1x16x16xf32>
    %10 = vector.shape_cast %9 : vector<1x16x16xf32> to vector<16x16xf32>
    %11 = vector.shape_cast %8 : vector<16x16xf32> to vector<1x16x16xf32>
    tpu.vector_store %arg5[%c0_9, %c0_10, %c0_11], %11 {strides = array<i32>} : memref<4x16x16xf32, #tpu.memory_space<vmem>>, vector<1x16x16xf32>,
    %12 = vector.extract_strided_slice %5 {offsets = [16, 0], sizes = [16, 16], strides = [1, 1]} : vector<64x16xf32> to vector<16x16xf32>
    %cst_12 = arith.constant dense<0.000000e+00> : vector<16x16xf32>
    %13 = tpu.matmul %0, %12, %cst_12 {dimension_numbers = #tpu.dot_dimension_numbers<[1], [0], [0], [1], [0, 0, 1, 1], [], []>} : vector<16x16xf32>, vector<16x16xf32>, vector<16x16xf32> -> vector<16x16xf32>
    %14 = arith.addf %13, %2 : vector<16x16xf32>
    %c1 = arith.constant 1 : index
    %c0_13 = arith.constant 0 : index
    %c0_14 = arith.constant 0 : index
    %15 = vector.load %arg5[%c1, %c0_13, %c0_14] : memref<4x16x16xf32, #tpu.memory_space<vmem>>, vector<1x16x16xf32>
    %16 = vector.shape_cast %15 : vector<1x16x16xf32> to vector<16x16xf32>
    %17 = vector.shape_cast %14 : vector<16x16xf32> to vector<1x16x16xf32>
    tpu.vector_store %arg5[%c1, %c0_13, %c0_14], %17 {strides = array<i32>} : memref<4x16x16xf32, #tpu.memory_space<vmem>>, vector<1x16x16xf32>,
    %18 = vector.extract_strided_slice %5 {offsets = [32, 0], sizes = [16, 16], strides = [1, 1]} : vector<64x16xf32> to vector<16x16xf32>
    %cst_15 = arith.constant dense<0.000000e+00> : vector<16x16xf32>
    %19 = tpu.matmul %0, %18, %cst_15 {dimension_numbers = #tpu.dot_dimension_numbers<[1], [0], [0], [1], [0, 0, 1, 1], [], []>} : vector<16x16xf32>, vector<16x16xf32>, vector<16x16xf32> -> vector<16x16xf32>
    %20 = arith.addf %19, %2 : vector<16x16xf32>
    %c2 = arith.constant 2 : index
    %c0_16 = arith.constant 0 : index
    %c0_17 = arith.constant 0 : index
    %21 = vector.load %arg5[%c2, %c0_16, %c0_17] : memref<4x16x16xf32, #tpu.memory_space<vmem>>, vector<1x16x16xf32>
    %22 = vector.shape_cast %21 : vector<1x16x16xf32> to vector<16x16xf32>
    %23 = vector.shape_cast %20 : vector<16x16xf32> to vector<1x16x16xf32>
    tpu.vector_store %arg5[%c2, %c0_16, %c0_17], %23 {strides = array<i32>} : memref<4x16x16xf32, #tpu.memory_space<vmem>>, vector<1x16x16xf32>,
    %24 = vector.extract_strided_slice %5 {offsets = [48, 0], sizes = [16, 16], strides = [1, 1]} : vector<64x16xf32> to vector<16x16xf32>
    %cst_18 = arith.constant dense<0.000000e+00> : vector<16x16xf32>
    %25 = tpu.matmul %0, %24, %cst_18 {dimension_numbers = #tpu.dot_dimension_numbers<[1], [0], [0], [1], [0, 0, 1, 1], [], []>} : vector<16x16xf32>, vector<16x16xf32>, vector<16x16xf32> -> vector<16x16xf32>
    %26 = arith.addf %25, %2 : vector<16x16xf32>
    %c3 = arith.constant 3 : index
    %c0_19 = arith.constant 0 : index
    %c0_20 = arith.constant 0 : index
    %27 = vector.load %arg5[%c3, %c0_19, %c0_20] : memref<4x16x16xf32, #tpu.memory_space<vmem>>, vector<1x16x16xf32>
    %28 = vector.shape_cast %27 : vector<1x16x16xf32> to vector<16x16xf32>
    %29 = vector.shape_cast %26 : vector<16x16xf32> to vector<1x16x16xf32>
    tpu.vector_store %arg5[%c3, %c0_19, %c0_20], %29 {strides = array<i32>} : memref<4x16x16xf32, #tpu.memory_space<vmem>>, vector<1x16x16xf32>,
    return
  }
  func.func @transform_0(%arg0: i32) -> (i32, i32) {
    %c0_i32 = arith.constant 0 : i32
    %c0_i32_0 = arith.constant 0 : i32
    %c0_i32_1 = arith.constant 0 : i32
    return %c0_i32, %c0_i32_0 : i32, i32
  }
  func.func @transform_1(%arg0: i32) -> (i32, i32) {
    %c0_i32 = arith.constant 0 : i32
    %c0_i32_0 = arith.constant 0 : i32
    %c0_i32_1 = arith.constant 0 : i32
    return %c0_i32, %c0_i32_0 : i32, i32
  }
  func.func @transform_2(%arg0: i32) -> (i32, i32) {
    %c0_i32 = arith.constant 0 : i32
    %c0_i32_0 = arith.constant 0 : i32
    %c0_i32_1 = arith.constant 0 : i32
    return %c0_i32, %c0_i32_0 : i32, i32
  }
  func.func @transform_3(%arg0: i32) -> (i32, i32, i32) {
    %c0_i32 = arith.constant 0 : i32
    %c0_i32_0 = arith.constant 0 : i32
    %c0_i32_1 = arith.constant 0 : i32
    return %arg0, %c0_i32, %c0_i32_0 : i32, i32, i32
  }
  func.func @transform_4(%arg0: i32) -> (i32, i32, i32) {
    %c0_i32 = arith.constant 0 : i32
    %c0_i32_0 = arith.constant 0 : i32
    %c0_i32_1 = arith.constant 0 : i32
    return %arg0, %c0_i32, %c0_i32_0 : i32, i32, i32
  }
}

</mosaic_0001>

<bundles_post_ra>
// kernel: tpu_custom_call.1
= control target key start
LH: loop header
LB: loop body
LE: loop exit
PB: predicated region body
PF: predicated region fallthrough
CT: control target
= control target key end

     0   :  { %9 = vsyncpa [#allocation3], 0  ;;  %s1585_s0 = inlined_call_operand.hbm [shape: f32[16,16], index: 0, kind: input, shape index: {}]   ;;  %s1586_s1 = inlined_call_operand.hbm [shape: f32[16,16], index: 1, kind: input, shape index: {}]   ;;  %s1587_s2 = inlined_call_operand.hbm [shape: f32[16,16], index: 2, kind: input, shape index: {}]   ;;  %s1588_s3 = inlined_call_operand.hbm [shape: f32[8,16,16], index: 3, kind: input, shape index: {}]   ;;  %s1589_s4 = inlined_call_operand.hbm [shape: f32[8,16,16], index: 4, kind: output, shape index: {}]  }
   0x1   :  { %10 = vsyncpa [#allocation6], 0 }
   0x2   :  { %11 = vsyncpa [#allocation9], 0 }
   0x3   :  { %13 = vsyncpa [#allocation9 + $0x1], 0 }
   0x4   :  { %14 = vsyncpa [#allocation4], 0 }
   0x5   :  { %16 = vsyncpa [#allocation4 + $0x1], 0  ;;  %s1286_s15 = smov 0   ;;  %s1288_s16 = smov 0  }
   0x6   :  { %s1290_s17 = smov 0   ;;  %s1292_s18 = smov 0  }
   0x7 LB: > { %s1307_s19 = sadd.s32 4294967295, %s1250_s18   ;;  %s843_s20 = sadd.s32 4294967294, %s1250_s18   ;;  %s1250_s18 = sphi %s1292_s18, %s1612_s18   ;;  %s1246_s17 = sphi %s1290_s17, %s1611_s17   ;;  %s1242_s16 = sphi %s1288_s16, %s1610_s16   ;;  %s1238_s15 = sphi %s1286_s15, %s1609_s15  }
   0x8   : > { %p105_p0 = scmp.ne.s32.totalorder %s1242_s16, %s1238_s15  ;;  %p1590_p1 = scmp.eq.s32.totalorder %s1307_s19, 0 }
   0x9   : > { %p135_p3 = scmp.eq.s32.totalorder %s843_s20, 1  ;;  %p844_p5 = scmp.ge.s32.totalorder %s1250_s18, 1 }
   0xa   : > { %p1316_p4 = por %p1590_p1, %p105_p0  ;;  %p142_p7 = scmp.lt.s32.totalorder %s1250_s18, 3 }
   0xb   : > { %p1321_p6 = por %p135_p3, %p105_p0  ;;  %s1252_s24 = smov [#allocation5]  }
   0xc   : > { %s1593_s21 = scalar_select %p1316_p4, 1, 0 }
   0xd   : > { %s1594_s22 = scalar_select %p1321_p6, 1, 0 }
   0xe   : > { %p1326_p8 = pnand %p844_p5, %p142_p7  ;;  %s167_s25 = sshll.u32 %s1252_s24, 4  ;;  %s1333_s25 = int_to_ptr.vmem [resolvable:$true] %s167_s25 }
   0xf   : > { %s1253_s27 = smov [#allocation2]   ;;  %s1254_s29 = smov [#allocation7]  }
  0x10   : > { %s1595_s23 = scalar_select %p1326_p8, 1, 0 }
  0x11   : > { %p997_p10 = pneg %p1326_p8  ;;  %s154_s28 = sshll.u32 %s1253_s27, 4  ;;  %s1341_s28 = int_to_ptr.vmem [resolvable:$true] %s154_s28 }
  0x12   : > { %s1343_s30 = sshll.u32 %s1254_s29, 4  ;;  %s1062_s7 = scalar_lea.hbm %s1586_s1, 256  ;;  %s181_s30 = int_to_ptr.vmem [resolvable:$true] %s1343_s30 }
  0x13   : > { %p1337_p11 = pnand %p997_p10, %p1590_p1  ;;  %p1063_p12 = scmp.ne.s32.totalorder %s1586_s1, %s1062_s7 }
  0x14   : > { %p1069_p5 = scmp.lt.u32.totalorder %s1062_s7, %s1586_s1 }
  0x15   : > { %p1353_p13 = pneg %p1337_p11 }
  0x17   : > { %p1065_p0 = pnand %p1353_p13, %p1063_p12 }
  0x19   : > { %p1066_p3 = pneg %p1065_p0 }
  0x1b   : > { %p1071_p7 = pnand %p1069_p5, %p1066_p3 }
  0x1d   : > { %1074 = shalt.err (!%p1071_p7)
}
  0x1e   : > { %s1075_s13 = scalar_lea.vmem %s1333_s25, 256  ;;  %p1083_p2 = scmp.lt.s32.totalorder %s1333_s25, %s1333_s25 }
  0x1f   : > { %p1076_p10 = scmp.ne.s32.totalorder %s1333_s25, %s1075_s13  ;;  %p1084_p6 = scmp.lt.s32.totalorder %s1075_s13, %s1075_s13 }
  0x21   : > { %p1078_p9 = pnand %p1076_p10, %p1353_p13  ;;  %p1085_p12 = por %p1084_p6, %p1083_p2 }
  0x23   : > { %p1079_p1 = pneg %p1078_p9 }
  0x25   : > { %p1086_p0 = pnand %p1085_p12, %p1079_p1 }
  0x27   : > { %1089 = shalt.err (!%p1086_p0)
}
  0x28   : > { %s1255_s14 = smov 128   ;;  %s1256_s20 = smov 8  }
  0x29   : > { %1003 = dma.hbm_to_vmem [thread:$0]  (!%p1337_p11), %s1586_s1, 256, %s1333_s25, [#allocation6], %s1255_s14, %s1255_s14, %s1256_s20  }
  0x2a   : > { %s1090_s6 = scalar_lea.hbm %s1585_s0, 256 }
  0x2b   : > { %p1091_p1 = scmp.ne.s32.totalorder %s1585_s0, %s1090_s6  ;;  %p1097_p9 = scmp.lt.u32.totalorder %s1090_s6, %s1585_s0 }
  0x2d   : > { %p1093_p2 = pnand %p1091_p1, %p1353_p13 }
  0x2f   : > { %p1094_p6 = pneg %p1093_p2 }
  0x31   : > { %p1099_p3 = pnand %p1097_p9, %p1094_p6 }
  0x33   : > { %1102 = shalt.err (!%p1099_p3)
}
  0x34   : > { %s1103_s25 = scalar_lea.vmem %s1341_s28, 256  ;;  %p1111_p12 = scmp.lt.s32.totalorder %s1341_s28, %s1341_s28 }
  0x35   : > { %p1104_p5 = scmp.ne.s32.totalorder %s1341_s28, %s1103_s25  ;;  %p1112_p0 = scmp.lt.s32.totalorder %s1103_s25, %s1103_s25 }
  0x37   : > { %p1106_p7 = pnand %p1104_p5, %p1353_p13  ;;  %p1113_p1 = por %p1112_p0, %p1111_p12 }
  0x39   : > { %p1107_p10 = pneg %p1106_p7 }
  0x3b   : > { %p1114_p2 = pnand %p1113_p1, %p1107_p10 }
  0x3d   : > { %1117 = shalt.err (!%p1114_p2)
}
  0x3e   : > { %1000 = dma.hbm_to_vmem [thread:$0]  (!%p1337_p11), %s1585_s0, 256, %s1341_s28, [#allocation3], %s1255_s14, %s1255_s14, %s1256_s20  }
  0x3f   : > { %s1118_s29 = scalar_lea.hbm %s1587_s2, 256 }
  0x40   : > { %p1119_p6 = scmp.ne.s32.totalorder %s1587_s2, %s1118_s29  ;;  %p1125_p5 = scmp.lt.u32.totalorder %s1118_s29, %s1587_s2 }
  0x42   : > { %p1121_p9 = pnand %p1119_p6, %p1353_p13 }
  0x44   : > { %p1122_p3 = pneg %p1121_p9 }
  0x46   : > { %p1127_p7 = pnand %p1125_p5, %p1122_p3 }
  0x48   : > { %1130 = shalt.err (!%p1127_p7)
}
  0x49   : > { %s1131_s9 = scalar_lea.vmem %s181_s30, 256  ;;  %p1139_p1 = scmp.lt.s32.totalorder %s181_s30, %s181_s30 }
  0x4a   : > { %p1132_p10 = scmp.ne.s32.totalorder %s181_s30, %s1131_s9  ;;  %p1140_p2 = scmp.lt.s32.totalorder %s1131_s9, %s1131_s9 }
  0x4c   : > { %p1134_p12 = pnand %p1132_p10, %p1353_p13  ;;  %p1141_p4 = por %p1140_p2, %p1139_p1 }
  0x4e   : > { %p1135_p0 = pneg %p1134_p12 }
  0x50   : > { %p1142_p8 = pnand %p1141_p4, %p1135_p0 }
  0x52   : > { %1145 = shalt.err (!%p1142_p8)
}
  0x53   : > { %1006 = dma.hbm_to_vmem [thread:$0]  (!%p1337_p11), %s1587_s2, 256, %s181_s30, [#allocation6], %s1255_s14, %s1255_s14, %s1256_s20  }
  0x54   : > { %s1426_s10 = sadd.s32 1, %s1250_s18   ;;  %s92_s25 = sadd.s32 1, %s1246_s17 }
  0x55   : > { %s89_s26 = ssub.s32 %s1250_s18, %s1426_s10  ;;  %p99_p8 = scmp.ne.s32.totalorder %s1246_s17, %s1242_s16 }
  0x56   : > { %p90_p4 = scmp.eq.s32.totalorder %s89_s26, 0  ;;  %p100_p13 = scmp.eq.s32.totalorder %s1250_s18, 0 }
  0x57   : > { %p1018_p6 = scmp.lt.s32.totalorder %s1250_s18, 2  ;;  %p1598_p3 = scmp.eq.s32.totalorder %s1307_s19, 1 }
  0x58   : > { %s1436_s12 = scalar_select %p90_p4, %s1246_s17, %s92_s25  }
  0x59   : > { %p101_p9 = por %p100_p13, %p99_p8  ;;  %p1440_p5 = por %p1598_p3, %p99_p8 }
  0x5a   : > { %s194_s24 = sand.u32 1, %s1246_s17   ;;  %s888_s27 = sshll.u32 %s1250_s18, 10 }
  0x5b   : > { %s849_s30 = sshll.u32 %s194_s24, 6  ;;  %s1449_s6 = scalar_lea.hbm %s1588_s3, %s888_s27 }
  0x5c   : > { %s198_s7 = scalar_lea.vmem [#allocation8], %s849_s30  ;;  %p1451_p11 = pnand %p1018_p6, %p101_p9 }
  0x5d   : > { %s206_s8 = sshll.u32 %s198_s7, 4  ;;  %s1457_s28 = scalar_lea.sflag [#allocation9], %s194_s24  ;;  %s1455_s8 = int_to_ptr.vmem [resolvable:$true] %s206_s8 }
  0x5e   : > { %s1146_s11 = scalar_lea.hbm %s1449_s6, 1024  ;;  %p1148_p10 = pneg %p1451_p11 }
  0x5f   : > { %p1147_p7 = scmp.ne.s32.totalorder %s1449_s6, %s1146_s11  ;;  %s1151_s27 = scalar_lea.hbm %s1588_s3, 2048 }
  0x60   : > { %p1152_p1 = scmp.lt.u32.totalorder %s1449_s6, %s1588_s3  ;;  %p1153_p2 = scmp.lt.u32.totalorder %s1151_s27, %s1146_s11 }
  0x61   : > { %p1149_p12 = pnand %p1148_p10, %p1147_p7  ;;  %p1155_p8 = scmp.lt.u32.totalorder %s1146_s11, %s1449_s6 }
  0x62   : > { %p1154_p4 = por %p1153_p2, %p1152_p1 }
  0x63   : > { %p1150_p0 = pneg %p1149_p12 }
  0x64   : > { %p1156_p13 = por %p1155_p8, %p1154_p4 }
  0x66   : > { %p1157_p6 = pnand %p1156_p13, %p1150_p0 }
  0x68   : > { %1160 = shalt.err (!%p1157_p6)
}
  0x69   : > { %s1161_s24 = scalar_lea.vmem %s1455_s8, 1024  ;;  %s1257_s5 = smov [#allocation8]  }
  0x6a   : > { %p1162_p9 = scmp.ne.s32.totalorder %s1455_s8, %s1161_s24  ;;  %s1166_s7 = sshll.u32 %s1257_s5, 4  ;;  %s1167_s7 = int_to_ptr.vmem [resolvable:$false] %s1166_s7 }
  0x6b   : > { %s1168_s26 = scalar_lea.vmem %s1167_s7, 2048  ;;  %p1169_p12 = scmp.lt.s32.totalorder %s1455_s8, %s1167_s7 }
  0x6c   : > { %p1164_p3 = pnand %p1162_p9, %p1148_p10  ;;  %p1170_p1 = scmp.lt.s32.totalorder %s1168_s26, %s1161_s24 }
  0x6e   : > { %p1165_p7 = pneg %p1164_p3  ;;  %p1171_p2 = por %p1170_p1, %p1169_p12 }
  0x70   : > { %p1172_p4 = pnand %p1171_p2, %p1165_p7 }
  0x72   : > { %1175 = shalt.err (!%p1172_p4)
}
  0x73   : > { %1010 = dma.hbm_to_vmem [thread:$0]  (!%p1451_p11), %s1449_s6, 1024, %s1455_s8, %s1457_s28, %s1255_s14, %s1255_s14, %s1256_s20  }
  0x74   : > { %p1601_p10 = scmp.ne.s32.totalorder %s1595_s23, 0 }
  0x75   : > { %p1602_p0 = scmp.eq.s32.totalorder (!%p1601_p10), %s1307_s19, 0 }
  0x76   : > { %218 = sbr.rel (%p1601_p10) target bundleno = 601 (0x259), region = 36 }
  0x7d   : > { %1221 = dma.done.wait (%p1602_p0), [#allocation3], 256   ;;  %p1603_p8 = pmov %p1602_p0 }
  0x7e   : > { %p1604_p13 = pmov %p1602_p0 }
  0x7f   : > { %1223 = vsyncadd (%p1603_p8), [#allocation3], 4294967040 }
  0x80   : > { %1225 = dma.done.wait (%p1604_p13), [#allocation6], 512   ;;  %p1605_p6 = pmov %p1602_p0 }
  0x81   : > { %s1499_s9 = sand.u32 1, %s1242_s16   ;;  %p1606_p11 = scmp.ne.s32.totalorder %s1593_s21, 0 }
  0x82   : > { %1227 = vsyncadd (%p1605_p6), [#allocation6], 4294966784  ;;  %s857_s23 = sshll.u32 %s1499_s9, 6  ;;  %s233_s14 = scalar_lea.sflag [#allocation9], %s1499_s9 }
  0x83   : > { %s236_s20 = scalar_lea.vmem [#allocation8], %s857_s23 }
  0x84   : > { %1229 = dma.done.wait (%p1606_p11), %s233_s14, 1024  }
  0x85   : > { %1231 = vsyncadd (%p1606_p11), %s233_s14, 4294966272  ;;  %vm277_vm0 = vcmask 130048   ;;  %v265_v0 = vld [vmem:[#allocation5] sm:$0xff]  ;;  %v266_v1 = vld [vmem:[#allocation5 + $0x8] sm:$0xff]  ;;  %s260_s21 = scalar_lea.vmem [#allocation10], %s857_s23  ;;  %s890_s6 = sshll.u32 %s1307_s19, 10 }
  0x86   : > { %v269_v2 = vld [vmem:[%s236_s20] sm:$0xff]  ;;  %v961_v3 = vpack.c.bf16 %v266_v1, %v265_v0  ;;  %v270_v4 = vld [vmem:[%s236_s20 + $0x8] sm:$0xff]  ;;  %v271_v5 = vld [vmem:[%s236_s20 + $0x10] sm:$0xff]  ;;  %s739_s8 = sshll.u32 %s260_s21, 4  ;;  %s1537_s25 = scalar_lea.hbm %s1589_s4, %s890_s6  ;;  %s1539_s8 = int_to_ptr.vmem [resolvable:$true] %s739_s8 }
  0x87   : > { %921 = vmatprep.mubr.msk.f32.mxu0 %vm277_vm0, %v269_v2  ;;  %v272_v6 = vld [vmem:[%s236_s20 + $0x18] sm:$0xff]  ;;  %v273_v7 = vld [vmem:[%s236_s20 + $0x20] sm:$0xff]  ;;  %v274_v8 = vld [vmem:[%s236_s20 + $0x28] sm:$0xff]  ;;  %s725_s19 = scalar_lea.sflag [#allocation4], %s1499_s9  ;;  %s1176_s27 = scalar_lea.vmem %s1539_s8, 1024 }
  0x88   : > { %962 = vmatprep.subr.bf16.mxu0 %v961_v3  ;;  %v275_v9 = vld [vmem:[%s236_s20 + $0x30] sm:$0xff]  ;;  %v276_v10 = vld [vmem:[%s236_s20 + $0x38] sm:$0xff]  ;;  %p1177_p9 = scmp.ne.s32.totalorder %s1539_s8, %s1176_s27  ;;  %s1258_s30 = smov [#allocation10]  }
  0x89   : > { %964 = vmatpush3.bf16.msra.mxu0 %v961_v3  ;;  %v263_v11 = vld [vmem:[#allocation2] sm:$0xff]  ;;  %v264_v17 = vld [vmem:[#allocation2 + $0x8] sm:$0xff]  ;;  %s1180_s29 = sshll.u32 %s1258_s30, 4  ;;  %s1181_s29 = int_to_ptr.vmem [resolvable:$false] %s1180_s29 }
  0x8a   : > { %937 = vmatprep.mubr.msk.f32.mxu1 %vm277_vm0, %v263_v11  ;;  %v268_v25 = vld [vmem:[#allocation7 + $0x8] sm:$0xff]  ;;  %v267_v26 = vld [vmem:[#allocation7] sm:$0xff]  ;;  %p1178_p3 = pnand %p1177_p9, %p1440_p5  ;;  %s1182_s24 = scalar_lea.vmem %s1181_s29, 2048 }
  0x8b   : > { %p1183_p12 = scmp.lt.s32.totalorder %s1539_s8, %s1181_s29  ;;  %p1184_p1 = scmp.lt.s32.totalorder %s1182_s24, %s1176_s27 }
  0x8c   : > { %922 = vmatmul.mubr.msk.f32.vlgmr.msra.gmra.mrb[0].mxu0 %vm277_vm0, %v270_v4  ;;  %p1179_p7 = pneg %p1178_p3 }
  0x8d   : > { %924 = vmatprep.mubr.msk.f32.mxu0 %vm277_vm0, %v271_v5  ;;  %p1185_p2 = por %p1184_p1, %p1183_p12 }
  0x8f   : > { %p1186_p4 = pnand %p1185_p2, %p1179_p7 }
  0x90   : > { %925 = vmatmul.mubr.msk.f32.gmra.mrb[2].mxu0 %vm277_vm0, %v272_v6 }
  0x91   : > { %927 = vmatprep.mubr.msk.f32.mxu0 %vm277_vm0, %v273_v7 }
  0x94   : > { %928 = vmatmul.mubr.msk.f32.gmra.mrb[4].mxu0 %vm277_vm0, %v274_v8 }
  0x95   : > { %930 = vmatprep.mubr.msk.f32.mxu0 %vm277_vm0, %v275_v9 }
  0x98   : > { %931 = vmatmul.mubr.msk.f32.gmra.mrb[6].mxu0 %vm277_vm0, %v276_v10 }
 0x15f   : > { %v923_v12 = vpop.f32.mrb[0].mxu0 }
 0x160   : > { %v368_v13 = vpop.f32.mrb[1].mxu0 }
 0x161   : > { %v965_v14 = vpack.c.bf16 %v923_v12, %v368_v13 }
 0x163   : > { %v926_v15 = vpop.f32.mrb[2].mxu0  ;;  %966 = vmatprep.subr.bf16.mxu1 %v965_v14 }
 0x164   : > { %v378_v16 = vpop.f32.mrb[3].mxu0  ;;  %968 = vmatpush3.bf16.msra.mxu1 %v965_v14 }
 0x165   : > { %v969_v18 = vpack.c.bf16 %v926_v15, %v378_v16 }
 0x167   : > { %v929_v19 = vpop.f32.mrb[4].mxu0  ;;  %938 = vmatmul.mubr.msk.f32.vlgmr.msra.gmra.mrb[0].mxu1 %vm277_vm0, %v264_v17  ;;  %970 = vmatprep.subr.bf16.mxu1 %v969_v18 }
 0x168   : > { %v388_v20 = vpop.f32.mrb[5].mxu0  ;;  %972 = vmatpush3.bf16.msra.mxu1 %v969_v18  ;;  %944 = vmatprep.mubr.msk.f32.mxu1 %vm277_vm0, %v263_v11 }
 0x169   : > { %v973_v21 = vpack.c.bf16 %v929_v19, %v388_v20 }
 0x16b   : > { %v932_v22 = vpop.f32.mrb[6].mxu0  ;;  %945 = vmatmul.mubr.msk.f32.vlgmr.msra.gmra.mrb[2].mxu1 %vm277_vm0, %v264_v17  ;;  %974 = vmatprep.subr.bf16.mxu1 %v973_v21 }
 0x16c   : > { %v398_v23 = vpop.f32.mrb[7].mxu0  ;;  %976 = vmatpush3.bf16.msra.mxu1 %v973_v21  ;;  %951 = vmatprep.mubr.msk.f32.mxu1 %vm277_vm0, %v263_v11 }
 0x16d   : > { %v977_v24 = vpack.c.bf16 %v932_v22, %v398_v23 }
 0x16f   : > { %952 = vmatmul.mubr.msk.f32.vlgmr.msra.gmra.mrb[4].mxu1 %vm277_vm0, %v264_v17  ;;  %978 = vmatprep.subr.bf16.mxu1 %v977_v24 }
 0x170   : > { %980 = vmatpush3.bf16.msra.mxu1 %v977_v24  ;;  %958 = vmatprep.mubr.msk.f32.mxu1 %vm277_vm0, %v263_v11 }
 0x173   : > { %959 = vmatmul.mubr.msk.f32.vlgmr.msra.gmra.mrb[6].mxu1 %vm277_vm0, %v264_v17 }
 0x23a   : > { %v939_v27 = vpop.f32.mrb[0].mxu1 }
 0x23b   : > { %v485_v28 = vadd.f32 %v939_v27, %v268_v25  ;;  %v479_v29 = vpop.f32.mrb[1].mxu1 }
 0x23c   : > { %v480_v30 = vadd.f32 %v479_v29, %v267_v26 }
 0x23d   : > { %489 = vst.msk [vmem:[%s260_s21 + $0x8] sm:$0xff] %vm277_vm0, %v485_v28 }
 0x23e   : > { %488 = vst.msk [vmem:[%s260_s21] sm:$0xff] %vm277_vm0, %v480_v30  ;;  %v946_v31 = vpop.f32.mrb[2].mxu1 }
 0x23f   : > { %v562_v32 = vadd.f32 %v946_v31, %v268_v25  ;;  %v556_v33 = vpop.f32.mrb[3].mxu1 }
 0x240   : > { %v557_v34 = vadd.f32 %v556_v33, %v267_v26 }
 0x241   : > { %872 = vst.msk [vmem:[%s260_s21 + $0x18] sm:$0xff] %vm277_vm0, %v562_v32 }
 0x242   : > { %871 = vst.msk [vmem:[%s260_s21 + $0x10] sm:$0xff] %vm277_vm0, %v557_v34  ;;  %v953_v35 = vpop.f32.mrb[4].mxu1 }
 0x243   : > { %v640_v36 = vadd.f32 %v953_v35, %v268_v25  ;;  %v634_v37 = vpop.f32.mrb[5].mxu1 }
 0x244   : > { %v635_v38 = vadd.f32 %v634_v37, %v267_v26 }
 0x245   : > { %876 = vst.msk [vmem:[%s260_s21 + $0x28] sm:$0xff] %vm277_vm0, %v640_v36 }
 0x246   : > { %875 = vst.msk [vmem:[%s260_s21 + $0x20] sm:$0xff] %vm277_vm0, %v635_v38  ;;  %v960_v39 = vpop.f32.mrb[6].mxu1 }
 0x247   : > { %v718_v40 = vadd.f32 %v960_v39, %v268_v25  ;;  %v712_v41 = vpop.f32.mrb[7].mxu1 }
 0x248   : > { %v713_v42 = vadd.f32 %v712_v41, %v267_v26 }
 0x249   : > { %880 = vst.msk [vmem:[%s260_s21 + $0x38] sm:$0xff] %vm277_vm0, %v718_v40 }
 0x24a   : > { %879 = vst.msk [vmem:[%s260_s21 + $0x30] sm:$0xff] %vm277_vm0, %v713_v42 }
 0x24b   : > { %1189 = shalt.err (!%p1186_p4)
}
 0x24c   : > { %s1190_s5 = scalar_lea.hbm %s1537_s25, 1024  ;;  %s1194_s23 = scalar_lea.hbm %s1589_s4, 2048 }
 0x24d   : > { %p1191_p10 = scmp.ne.s32.totalorder %s1537_s25, %s1190_s5  ;;  %p1195_p13 = scmp.lt.u32.totalorder %s1537_s25, %s1589_s4 }
 0x24e   : > { %p1196_p6 = scmp.lt.u32.totalorder %s1194_s23, %s1190_s5  ;;  %p1198_p9 = scmp.lt.u32.totalorder %s1190_s5, %s1537_s25 }
 0x24f   : > { %p1192_p0 = pnand %p1191_p10, %p1440_p5 }
 0x250   : > { %p1197_p11 = por %p1196_p6, %p1195_p13 }
 0x251   : > { %p1193_p8 = pneg %p1192_p0 }
 0x252   : > { %p1199_p3 = por %p1198_p9, %p1197_p11 }
 0x254   : > { %p1200_p7 = pnand %p1199_p3, %p1193_p8 }
 0x256   : > { %1203 = shalt.err (!%p1200_p7)
}
 0x257   : > { %s1259_s21 = smov 128   ;;  %s1260_s6 = smov 8  }
 0x258   : > { %995 = dma.vmem_to_hbm [thread:$0]  (%p1440_p5), %s1539_s8, 1024, %s1537_s25, %s725_s19, %s1259_s21, %s1259_s21, %s1260_s6  }
 0x259 PF: > { %s754_s28 = sand.u32 1, %s1238_s15   ;;  %p1607_p12 = scmp.ne.s32.totalorder %s1594_s22, 0 }
 0x25a   : > { %p1608_p1 = scmp.ge.s32.totalorder %s1250_s18, 2  ;;  %s755_s11 = scalar_lea.sflag [#allocation4], %s754_s28 }
 0x25c   : > { %p1012_p2 = pnand %p1608_p1, %p1607_p12 }
 0x25e   : > { %1233 = dma.done.wait (!%p1012_p2), %s755_s11, 1024  }
 0x25f   : > { %1235 = vsyncadd (!%p1012_p2), %s755_s11, 4294966272  ;;  %p19_p4 = scmp.ge.s32.totalorder %s1426_s10, 4   ;;  %s1609_s15 = smov %s1242_s16 }
 0x260   : > { %s1610_s16 = smov %s1246_s17  ;;  %s1611_s17 = smov %s1436_s12 }
 0x261   : > { %s1612_s18 = smov %s1426_s10  ;;  %21 = sbr.rel (!%p19_p4) target bundleno = 7 (0x7), region = 97 }
 0x268   :  { %760 = vsyncpa [#allocation3], 1 }
 0x269   :  { %762 = vsyncpa [#allocation3 + $0x1], 1 }
 0x26a   :  { %763 = vsyncpa [#allocation6], 1 }
 0x26b   :  { %764 = vsyncpa [#allocation9], 1 }
 0x26c   :  { %766 = vsyncpa [#allocation9 + $0x1], 1 }
 0x26d   :  { %767 = vsyncpa [#allocation4], 1 }
 0x26e   :  { %769 = vsyncpa [#allocation4 + $0x1], 1 }

</bundles_post_ra>
